<compile_context>
chip_gen: v7x
topology: tpu7x:2x2x1
jax: 0.10.0
libtpu: 0.0.40
codegen_flags: <defaults>
</compile_context>

<pallas_src>
import jax
import jax.numpy as jnp
import numpy as np
from jax.experimental import pallas as pl
from jax.experimental.pallas import tpu as pltpu

DIM = 2                       # self.dim
NZ = 1                        # internal-variable columns (uz)
H = 32                        # hidden width of NeuralNetEvolution
ODIM = DIM + NZ               # MLP output: [node_pl (DIM) | node_z (NZ)]
IN_F = DIM + DIM + 1 + NZ     # MLP input:  [neps_dot | nel | nrho | nz] = 6
IN_PAD = 8                    # padded activation rows: [x (6) | ones | zeros]
YF = DIM + 1 + NZ             # state features per material point = 4
B = 128                       # material points (lane axis)
S = 16                        # fused RHS evaluations per pallas_call
T_STEPS = 5                   # tabulated eps_dot time steps


def nice_rhs_kernel(x_ref, w1_ref, w2_ref, b2_ref, w3_ref, b3_ref, o_ref):
    """One fused block: 3 matmuls over (IN_PAD, N) activations, N = S*B lanes.

    x_ref rows: 0..1 ueps_dot | 2..3 uel | 4 urho | 5 uz | 6 ones | 7 zeros.
    Normalization is pre-folded into w1/row-6; DeNormalization into w3/b3.
    """
    x = x_ref[...]                                                   # (8, N)

    # Layer 1 (bias + input normalization folded into w1 via the ones row).
    h = jnp.dot(w1_ref[...], x, preferred_element_type=jnp.float32)  # (H, N)
    h = jnp.maximum(h, 0.0)

    # Layer 2.
    h = jnp.dot(w2_ref[...], h, preferred_element_type=jnp.float32) + b2_ref[...]
    h = jnp.maximum(h, 0.0)

    # Layer 3 (DeNormalize folded in): dn = DeNorm(nodes).
    dn = jnp.dot(w3_ref[...], h, preferred_element_type=jnp.float32) + b3_ref[...]

    ueps = x_ref[0:DIM, :]                                           # (DIM, N)
    urho = x_ref[2 * DIM:2 * DIM + 1, :]                             # (1, N)

    # Write the three output row groups directly (no concat + full store).
    o_ref[0:DIM, :] = ueps - dn[0:DIM, :]                            # uode_el
    o_ref[DIM:DIM + 1, :] = urho * ueps[0:1, :]                      # uode_rho
    o_ref[DIM + 1:DIM + 1 + NZ, :] = dn[DIM:DIM + NZ, :]             # uode_z


def init_params(key):
    ks = jax.random.split(key, 16)
    p = {}
    # MLP weights (synthetic init; shapes follow constructor(params_f) with
    # params_f = [IN_F, ODIM, [H, H], 'relu'])
    p["w1"] = jax.random.normal(ks[0], (IN_F, H), jnp.float32) / np.sqrt(IN_F)
    p["b1"] = 0.01 * jax.random.normal(ks[1], (1, H), jnp.float32)
    p["w2"] = jax.random.normal(ks[2], (H, H), jnp.float32) / np.sqrt(H)
    p["b2"] = 0.01 * jax.random.normal(ks[3], (1, H), jnp.float32)
    p["w3"] = jax.random.normal(ks[4], (H, ODIM), jnp.float32) / np.sqrt(H)
    p["b3"] = 0.01 * jax.random.normal(ks[5], (1, ODIM), jnp.float32)

    # normalization parameters: row 0 = scale (prm[0]), row 1 = shift (prm[1])
    def norm_pair(k1, k2, n):
        scale = 0.5 + jax.random.uniform(k1, (n,), jnp.float32)   # strictly positive
        shift = 0.1 * jax.random.normal(k2, (n,), jnp.float32)
        return jnp.stack([scale, shift])

    p["prm_e"] = norm_pair(ks[6], ks[7], DIM)
    p["prm_de"] = norm_pair(ks[8], ks[9], DIM)
    p["prm_rho"] = norm_pair(ks[10], ks[11], 1)
    p["prm_z"] = norm_pair(ks[12], ks[13], NZ)
    p["prm_dz"] = norm_pair(ks[14], ks[15], NZ)
    p["prm_dt"] = jnp.float32(0.1)
    p["prm_ee"] = p["prm_e"] * 0.5        # frac = 0.5 in __init__
    return p


def pack_params(p):
    """Fold Normalize into layer 1 and DeNormalize into layer 3 (done once).

    Returns (w1p, w2t, b2, w3f, b3f):
      w1p (H, IN_PAD): cols 0..5 = W1^T * 1/scale, col 6 = b1 - W1^T(shift/scale),
                       col 7 = 0 (pad row).
      w2t (H, H), b2 (H, 1): layer-2 weights/bias, feature-major.
      w3f (ODIM, H), b3f (ODIM, 1): layer-3 with DeNorm scale/shift folded in.
    """
    scale = jnp.concatenate(
        [p["prm_de"][0], p["prm_ee"][0], p["prm_rho"][0], p["prm_z"][0]])
    shift = jnp.concatenate(
        [p["prm_de"][1], p["prm_ee"][1], p["prm_rho"][1], p["prm_z"][1]])
    inv = 1.0 / scale

    w1t = p["w1"].T                                   # (H, IN_F)
    w1_fold = w1t * inv[None, :]
    b1_fold = p["b1"][0] - w1t @ (shift * inv)        # (H,)
    w1p = jnp.zeros((H, IN_PAD), jnp.float32)
    w1p = w1p.at[:, :IN_F].set(w1_fold)
    w1p = w1p.at[:, IN_F].set(b1_fold)                # consumed by the ones row

    w2t = p["w2"].T                                   # (H, H)
    b2 = p["b2"].T                                    # (H, 1)

    dscale = jnp.concatenate([p["prm_de"][0], p["prm_dz"][0]])   # (ODIM,)
    dshift = jnp.concatenate([p["prm_de"][1], p["prm_dz"][1]])   # (ODIM,)
    w3f = p["w3"].T * dscale[:, None]                 # (ODIM, H)
    b3f = (p["b3"][0] * dscale + dshift)[:, None]     # (ODIM, 1)
    return w1p, w2t, b2, w3f, b3f


def nice_forward_steps(ts, ys, eps_dot, packed, prm_dt):
    """Evaluate NICE.forward(t_s, y_s) for all s in ONE fused pallas_call.

    ts:      (S,)            evaluation times
    ys:      (S, B, YF)      states at each evaluation point
    eps_dot: (T, B, DIM)     tabulated strain-rate table
    returns: (S, B, YF)      dy/dt at each (t_s, y_s)
    """
    # TODO(synk): the scipy-interp1d inference branch (self.inference != False)
    # has no Pallas equivalent; only the tabulated eps_dot branch is implemented.
    w1p, w2t, b2, w3f, b3f = packed
    s_n, b_n, yf = ys.shape
    n = s_n * b_n
    nsteps = eps_dot.shape[0]

    # Tabulated time-step lookup (tiny XLA gather on a few-KB table).
    # Epsilon compensates f32 truncation vs. PyTorch's float64 int(t / dt).
    step = jnp.floor(ts / prm_dt + 1e-6).astype(jnp.int32)
    step = jnp.clip(step, 0, nsteps - 1)
    step = jnp.where(ts > 1.0, nsteps - 1, step)
    eps_g = eps_dot[step]                                  # (S, B, DIM)

    # Packed activation slab, feature-major with S*B on the lane axis:
    # rows = [ueps_dot (2) | uel (2) | urho (1) | uz (1) | ones (1) | zeros (1)].
    x_flat = jnp.concatenate(
        [eps_g.reshape(n, DIM),
         ys.reshape(n, yf),
         jnp.ones((n, 1), jnp.float32),
         jnp.zeros((n, IN_PAD - IN_F - 1), jnp.float32)], axis=1)   # (N, 8)
    x = x_flat.T                                           # (8, N)

    # 2 "parallel" lane blocks when wide enough (v7x: one per TensorCore);
    # otherwise a single full block.  Weights use constant index_maps so they
    # are DMA'd once and stay VMEM-resident.
    if n >= 256 and (n // 2) % 128 == 0:
        lane_blk = n // 2
    else:
        lane_blk = n
    grid = (n // lane_blk,)

    out_fm = pl.pallas_call(
        nice_rhs_kernel,
        grid_spec=pl.GridSpec(
            grid=grid,
            in_specs=[
                pl.BlockSpec((IN_PAD, lane_blk), lambda i: (0, i)),
                pl.BlockSpec((H, IN_PAD), lambda i: (0, 0)),
                pl.BlockSpec((H, H), lambda i: (0, 0)),
                pl.BlockSpec((H, 1), lambda i: (0, 0)),
                pl.BlockSpec((ODIM, H), lambda i: (0, 0)),
                pl.BlockSpec((ODIM, 1), lambda i: (0, 0)),
            ],
            out_specs=pl.BlockSpec((YF, lane_blk), lambda i: (0, i)),
        ),
        out_shape=jax.ShapeDtypeStruct((YF, n), jnp.float32),
        compiler_params=pltpu.CompilerParams(
            dimension_semantics=("parallel",)),
    )(x, w1p, w2t, b2, w3f, b3f)

    # Back to the (S, B, YF) interface layout.  (An ODE integrator that keeps
    # the feature-major layout end-to-end can consume out_fm directly.)
    return out_fm.reshape(YF, s_n, b_n).transpose(1, 2, 0)


def nice_forward(t, y, eps_dot, packed, prm_dt):
    """Original single-(t, y) forward interface (S = 1 fused call)."""
    out = nice_forward_steps(jnp.reshape(jnp.asarray(t, jnp.float32), (1,)),
                             y[None], eps_dot, packed, prm_dt)
    return out[0]


def nice_forward_ref(t, y, eps_dot, p):
    """Pure-JAX reference of the PyTorch forward (for correctness check)."""
    nsteps = eps_dot.shape[0]
    step = jnp.floor(t / p["prm_dt"] + 1e-6).astype(jnp.int32)
    step = jnp.clip(step, 0, nsteps - 1)
    step = jnp.where(t > 1.0, nsteps - 1, step)
    ueps_dot = eps_dot[step]
    uel = y[:, :DIM]
    urho = y[:, DIM:DIM + 1]
    uz = y[:, DIM + 1:]
    norm = lambda v, prm: (v - prm[1]) / prm[0]
    denorm = lambda v, prm: v * prm[0] + prm[1]
    nx = jnp.concatenate(
        [norm(ueps_dot, p["prm_de"]), norm(uel, p["prm_ee"]),
         norm(urho, p["prm_rho"]), norm(uz, p["prm_z"])], axis=-1)
    h = jnp.maximum(nx @ p["w1"] + p["b1"], 0.0)
    h = jnp.maximum(h @ p["w2"] + p["b2"], 0.0)
    nodes = h @ p["w3"] + p["b3"]
    node_pl = nodes[:, :DIM]
    node_z = nodes[:, DIM:DIM + 1]
    uode_el = ueps_dot - denorm(node_pl, p["prm_de"])
    uode_rho = urho * ueps_dot[:, :1]
    uode_z = denorm(node_z, p["prm_dz"])
    return jnp.concatenate([uode_el, uode_rho, uode_z], axis=-1)


if __name__ == "__main__":
    key = jax.random.PRNGKey(0)
    kp, ky, ke = jax.random.split(key, 3)
    params = init_params(kp)
    packed = pack_params(params)   # norm/denorm folded into weights, done once

    # S fused RHS evaluation points, B material points each.
    ys = jax.random.normal(ky, (S, B, YF), jnp.float32)
    eps_dot = 0.1 * jax.random.normal(ke, (T_STEPS, B, DIM), jnp.float32)
    ts = jnp.linspace(0.0, 1.2, S).astype(jnp.float32)   # covers t<=1 and t>1 branches

    fwd = jax.jit(nice_forward_steps)
    out = jax.block_until_ready(
        fwd(ts, ys, eps_dot, packed, params["prm_dt"]))
    assert out.shape == (S, B, YF)

    ref = jnp.stack([nice_forward_ref(ts[i], ys[i], eps_dot, params)
                     for i in range(S)])
    np.testing.assert_allclose(np.asarray(out), np.asarray(ref),
                               rtol=1e-4, atol=1e-5)

    # Original single-evaluation forward(t, y) interface.
    t0 = jnp.float32(0.3)
    out0 = jax.block_until_ready(
        nice_forward(t0, ys[0], eps_dot, packed, params["prm_dt"]))
    ref0 = nice_forward_ref(t0, ys[0], eps_dot, params)
    np.testing.assert_allclose(np.asarray(out0), np.asarray(ref0),
                               rtol=1e-4, atol=1e-5)

    print("KERNEL_OK")
</pallas_src>

<mosaic_0001>
module attributes {stable_mosaic.version = 11 : i64} {
  func.func @nice_rhs_kernel(%arg0: i32, %arg1: memref<8x1024xf32, #tpu.memory_space<vmem>>, %arg2: memref<32x8xf32, #tpu.memory_space<vmem>>, %arg3: memref<32x32xf32, #tpu.memory_space<vmem>>, %arg4: memref<32x1xf32, #tpu.memory_space<vmem>>, %arg5: memref<3x32xf32, #tpu.memory_space<vmem>>, %arg6: memref<3x1xf32, #tpu.memory_space<vmem>>, %arg7: memref<4x1024xf32, #tpu.memory_space<vmem>>) attributes {dimension_semantics = [#tpu.dimension_semantics<parallel>], iteration_bounds = array<i64: 2>, scalar_prefetch = 0 : i64, scratch_operands = 0 : i64, tpu.core_type = #tpu.core_type<tc>, window_params = [{transform_indices = @transform_0, window_bounds = array<i64: 8, 1024>}, {pipeline_mode = #tpu.pipeline_mode<synchronous>, transform_indices = @transform_1, window_bounds = array<i64: 32, 8>}, {pipeline_mode = #tpu.pipeline_mode<synchronous>, transform_indices = @transform_2, window_bounds = array<i64: 32, 32>}, {pipeline_mode = #tpu.pipeline_mode<synchronous>, transform_indices = @transform_3, window_bounds = array<i64: 32, 1>}, {pipeline_mode = #tpu.pipeline_mode<synchronous>, transform_indices = @transform_4, window_bounds = array<i64: 3, 32>}, {pipeline_mode = #tpu.pipeline_mode<synchronous>, transform_indices = @transform_5, window_bounds = array<i64: 3, 1>}, {transform_indices = @transform_6, window_bounds = array<i64: 4, 1024>}]} {
    %c0 = arith.constant 0 : index
    %c0_0 = arith.constant 0 : index
    %0 = vector.load %arg1[%c0, %c0_0] : memref<8x1024xf32, #tpu.memory_space<vmem>>, vector<8x1024xf32>
    %c0_1 = arith.constant 0 : index
    %c0_2 = arith.constant 0 : index
    %1 = vector.load %arg2[%c0_1, %c0_2] : memref<32x8xf32, #tpu.memory_space<vmem>>, vector<32x8xf32>
    %cst = arith.constant dense<0.000000e+00> : vector<32x1024xf32>
    %2 = tpu.matmul %1, %0, %cst {dimension_numbers = #tpu.dot_dimension_numbers<[1], [0], [0], [1], [0, 0, 1, 1], [], []>} : vector<32x8xf32>, vector<8x1024xf32>, vector<32x1024xf32> -> vector<32x1024xf32>
    %cst_3 = arith.constant 0.000000e+00 : f32
    %3 = vector.broadcast %cst_3 : f32 to vector<32x1024xf32>
    %4 = arith.maximumf %2, %3 : vector<32x1024xf32>
    %c0_4 = arith.constant 0 : index
    %c0_5 = arith.constant 0 : index
    %5 = vector.load %arg3[%c0_4, %c0_5] : memref<32x32xf32, #tpu.memory_space<vmem>>, vector<32x32xf32>
    %cst_6 = arith.constant dense<0.000000e+00> : vector<32x1024xf32>
    %6 = tpu.matmul %5, %4, %cst_6 {dimension_numbers = #tpu.dot_dimension_numbers<[1], [0], [0], [1], [0, 0, 1, 1], [], []>} : vector<32x32xf32>, vector<32x1024xf32>, vector<32x1024xf32> -> vector<32x1024xf32>
    %c0_7 = arith.constant 0 : index
    %c0_8 = arith.constant 0 : index
    %7 = vector.load %arg4[%c0_7, %c0_8] : memref<32x1xf32, #tpu.memory_space<vmem>>, vector<32x1xf32>
    %8 = vector.broadcast %7 : vector<32x1xf32> to vector<32x1024xf32>
    %9 = arith.addf %6, %8 : vector<32x1024xf32>
    %cst_9 = arith.constant 0.000000e+00 : f32
    %10 = vector.broadcast %cst_9 : f32 to vector<32x1024xf32>
    %11 = arith.maximumf %9, %10 : vector<32x1024xf32>
    %c0_10 = arith.constant 0 : index
    %c0_11 = arith.constant 0 : index
    %12 = vector.load %arg5[%c0_10, %c0_11] : memref<3x32xf32, #tpu.memory_space<vmem>>, vector<3x32xf32>
    %cst_12 = arith.constant dense<0.000000e+00> : vector<3x1024xf32>
    %13 = tpu.matmul %12, %11, %cst_12 {dimension_numbers = #tpu.dot_dimension_numbers<[1], [0], [0], [1], [0, 0, 1, 1], [], []>} : vector<3x32xf32>, vector<32x1024xf32>, vector<3x1024xf32> -> vector<3x1024xf32>
    %c0_13 = arith.constant 0 : index
    %c0_14 = arith.constant 0 : index
    %14 = vector.load %arg6[%c0_13, %c0_14] : memref<3x1xf32, #tpu.memory_space<vmem>>, vector<3x1xf32>
    %15 = vector.broadcast %14 : vector<3x1xf32> to vector<3x1024xf32>
    %16 = arith.addf %13, %15 : vector<3x1024xf32>
    %c0_15 = arith.constant 0 : index
    %c0_16 = arith.constant 0 : index
    %17 = vector.load %arg1[%c0_15, %c0_16] : memref<8x1024xf32, #tpu.memory_space<vmem>>, vector<2x1024xf32>
    %c4 = arith.constant 4 : index
    %c0_17 = arith.constant 0 : index
    %18 = vector.load %arg1[%c4, %c0_17] : memref<8x1024xf32, #tpu.memory_space<vmem>>, vector<1x1024xf32>
    %19 = vector.extract_strided_slice %16 {offsets = [0, 0], sizes = [2, 1024], strides = [1, 1]} : vector<3x1024xf32> to vector<2x1024xf32>
    %20 = arith.subf %17, %19 : vector<2x1024xf32>
    %c0_18 = arith.constant 0 : index
    %c0_19 = arith.constant 0 : index
    %21 = vector.load %arg7[%c0_18, %c0_19] : memref<4x1024xf32, #tpu.memory_space<vmem>>, vector<2x1024xf32>
    tpu.vector_store %arg7[%c0_18, %c0_19], %20 {strides = array<i32>} : memref<4x1024xf32, #tpu.memory_space<vmem>>, vector<2x1024xf32>,
    %22 = vector.extract_strided_slice %17 {offsets = [0, 0], sizes = [1, 1024], strides = [1, 1]} : vector<2x1024xf32> to vector<1x1024xf32>
    %23 = arith.mulf %18, %22 : vector<1x1024xf32>
    %c2 = arith.constant 2 : index
    %c0_20 = arith.constant 0 : index
    %24 = vector.load %arg7[%c2, %c0_20] : memref<4x1024xf32, #tpu.memory_space<vmem>>, vector<1x1024xf32>
    tpu.vector_store %arg7[%c2, %c0_20], %23 {strides = array<i32>} : memref<4x1024xf32, #tpu.memory_space<vmem>>, vector<1x1024xf32>,
    %25 = vector.extract_strided_slice %16 {offsets = [2, 0], sizes = [1, 1024], strides = [1, 1]} : vector<3x1024xf32> to vector<1x1024xf32>
    %c3 = arith.constant 3 : index
    %c0_21 = arith.constant 0 : index
    %26 = vector.load %arg7[%c3, %c0_21] : memref<4x1024xf32, #tpu.memory_space<vmem>>, vector<1x1024xf32>
    tpu.vector_store %arg7[%c3, %c0_21], %25 {strides = array<i32>} : memref<4x1024xf32, #tpu.memory_space<vmem>>, vector<1x1024xf32>,
    return
  }
  func.func @transform_0(%arg0: i32) -> (i32, i32) {
    %c0_i32 = arith.constant 0 : i32
    %c0_i32_0 = arith.constant 0 : i32
    return %c0_i32, %arg0 : i32, i32
  }
  func.func @transform_1(%arg0: i32) -> (i32, i32) {
    %c0_i32 = arith.constant 0 : i32
    %c0_i32_0 = arith.constant 0 : i32
    %c0_i32_1 = arith.constant 0 : i32
    return %c0_i32, %c0_i32_0 : i32, i32
  }
  func.func @transform_2(%arg0: i32) -> (i32, i32) {
    %c0_i32 = arith.constant 0 : i32
    %c0_i32_0 = arith.constant 0 : i32
    %c0_i32_1 = arith.constant 0 : i32
    return %c0_i32, %c0_i32_0 : i32, i32
  }
  func.func @transform_3(%arg0: i32) -> (i32, i32) {
    %c0_i32 = arith.constant 0 : i32
    %c0_i32_0 = arith.constant 0 : i32
    %c0_i32_1 = arith.constant 0 : i32
    return %c0_i32, %c0_i32_0 : i32, i32
  }
  func.func @transform_4(%arg0: i32) -> (i32, i32) {
    %c0_i32 = arith.constant 0 : i32
    %c0_i32_0 = arith.constant 0 : i32
    %c0_i32_1 = arith.constant 0 : i32
    return %c0_i32, %c0_i32_0 : i32, i32
  }
  func.func @transform_5(%arg0: i32) -> (i32, i32) {
    %c0_i32 = arith.constant 0 : i32
    %c0_i32_0 = arith.constant 0 : i32
    %c0_i32_1 = arith.constant 0 : i32
    return %c0_i32, %c0_i32_0 : i32, i32
  }
  func.func @transform_6(%arg0: i32) -> (i32, i32) {
    %c0_i32 = arith.constant 0 : i32
    %c0_i32_0 = arith.constant 0 : i32
    return %c0_i32, %arg0 : i32, i32
  }
}

</mosaic_0001>

<bundles_post_ra>
// kernel: nice_forward_steps.1
= control target key start
LH: loop header
LB: loop body
LE: loop exit
PB: predicated region body
PF: predicated region fallthrough
CT: control target
= control target key end

     0   :  { %11 = vsyncpa [#allocation3], 0  ;;  %s2198_s0 = inlined_call_operand.vmem [shape: f32[8,2048], index: 0, kind: input, shape index: {}]   ;;  %s2199_s1 = inlined_call_operand.vmem [shape: f32[32,8], index: 1, kind: input, shape index: {}]   ;;  %s2200_s2 = inlined_call_operand.vmem [shape: f32[32,32], index: 2, kind: input, shape index: {}]   ;;  %s2201_s3 = inlined_call_operand.vmem [shape: f32[32,1], index: 3, kind: input, shape index: {}]   ;;  %s2202_s4 = inlined_call_operand.vmem [shape: f32[3,32], index: 4, kind: input, shape index: {}]   ;;  %s2203_s5 = inlined_call_operand.vmem [shape: f32[3,1], index: 5, kind: input, shape index: {}]   ;;  %s2204_s6 = inlined_call_operand.hbm [shape: f32[4,2048], index: 6, kind: output, shape index: {}]  }
   0x1   :  { %13 = vsyncpa [#allocation3 + $0x1], 0  ;;  %s1892_s21 = smov 0   ;;  %s1894_s22 = smov 0  }
   0x2   :  { %s1896_s23 = smov 0   ;;  %s1898_s24 = smov 0  }
   0x3 LB: > { %s1913_s25 = sadd.s32 4294967295, %s1851_s24   ;;  %s1624_s26 = sadd.s32 4294967294, %s1851_s24   ;;  %s1851_s24 = sphi %s1898_s24, %s2210_s24   ;;  %s1847_s23 = sphi %s1896_s23, %s2209_s23   ;;  %s1843_s22 = sphi %s1894_s22, %s2208_s22   ;;  %s1839_s21 = sphi %s1892_s21, %s2207_s21  }
   0x4   : > { %s1917_s27 = sadd.s32 1, %s1851_s24   ;;  %s157_s28 = sadd.s32 1, %s1847_s23 }
   0x5   : > { %s154_s29 = ssub.s32 %s1851_s24, %s1917_s27  ;;  %p167_p0 = scmp.ne.s32.totalorder %s1847_s23, %s1843_s22 }
   0x6   : > { %p155_p1 = scmp.eq.s32.totalorder %s154_s29, 0  ;;  %p168_p2 = scmp.eq.s32.totalorder %s1913_s25, 1 }
   0x7   : > { %p173_p3 = scmp.ne.s32.totalorder %s1843_s22, %s1839_s21  ;;  %p174_p4 = scmp.eq.s32.totalorder %s1624_s26, 1 }
   0x8   : > { %s1928_s30 = scalar_select %p155_p1, %s1847_s23, %s157_s28  }
   0x9   : > { %p1930_p5 = por %p168_p2, %p167_p0  ;;  %p1934_p6 = por %p174_p4, %p173_p3 }
   0xa   : > { %p1627_p7 = scmp.ge.s32.totalorder %s1851_s24, 1  ;;  %p216_p8 = scmp.lt.s32.totalorder %s1851_s24, 3 }
   0xc   : > { %p217_p9 = pnand %p1627_p7, %p216_p8 }
   0xd   : > { %s1629_s9 = sshll.u32 (!%p217_p9), %s1913_s25, 3  ;;  %v1853_v0 = vmov (!%p217_p9), 0.0   ;;  %v261_v1 = vld [vmem:[%s2199_s1] sm:$0xff] (!%p217_p9)  ;;  %vm265_vm0 = vcmask (!%p217_p9), 64512   ;;  %v262_v10 = vld [vmem:[%s2199_s1 + $0x8] sm:$0xff] (!%p217_p9)  ;;  %v263_v11 = vld [vmem:[%s2199_s1 + $0x10] sm:$0xff] (!%p217_p9) }
   0xe   : > { %220 = sbr.rel (%p217_p9) target bundleno = 751 (0x2ef), region = 44  ;;  %p247_p10 = scmp.lt.s32.totalorder (!%p217_p9), %s1629_s9, 15  ;;  %342 = vmatprep.mubr.f32.mxu0 (!%p217_p9), %v1853_v0  ;;  %431 = vmatprep.mubr.f32.mxu1 (!%p217_p9), %v1853_v0  ;;  %v264_v12 = vld [vmem:[%s2199_s1 + $0x18] sm:$0xff] (!%p217_p9)  ;;  %v670_v13 = vld [vmem:[%s2201_s3] sm:$0xff] (!%p217_p9)  ;;  %v672_v14 = vld [vmem:[%s2201_s3 + $0x10] sm:$0xff] (!%p217_p9)  ;;  %v1854_v15 = vmov (!%p217_p9), 0  }
   0xf   : > { %1783 = vset.pattern.permute.xlu0 (!%p217_p9), %v1854_v15  ;;  %1784 = vset.pattern.permute.xlu1 (!%p217_p9), %v1854_v15  ;;  %v671_v16 = vld [vmem:[%s2201_s3 + $0x8] sm:$0xff] (!%p217_p9)  ;;  %v673_v17 = vld [vmem:[%s2201_s3 + $0x18] sm:$0xff] (!%p217_p9)  ;;  %v1096_v18 = vld [vmem:[%s2203_s5] sm:$0x7] (!%p217_p9)  ;;  %vm694_vm1 = vcmask (!%p217_p9), 261120   ;;  %s243_s14 = sand.u32 (!%p217_p9), 1, %s1843_s22  }
  0x10   : > { %676 = vperm.xlu0 (!%p217_p9), %1783, %v670_v13   ;;  %686 = vperm.xlu1 (!%p217_p9), %1784, %v672_v14   ;;  %v2018_v63 = vld [vmem:[%s2200_s2] sm:$0xff] (!%p217_p9)  ;;  %v667_v15 = vld [vmem:[%s2200_s2 + $0x8] sm:$0xff] (!%p217_p9)  ;;  %s1628_s15 = sshll.u32 (!%p217_p9), %s243_s14, 5  ;;  %s1551_s26 = scalar_lea.sflag (!%p217_p9), [#allocation3], %s243_s14 }
  0x11   : > { %s2135_s16 = scalar_lea.vmem (!%p217_p9), [#allocation2], %s1628_s15  ;;  %s1856_s28 = smov (!%p217_p9), [#allocation2]  }
  0x12   : > { %s1565_s17 = sshll.u32 (!%p217_p9), %s2135_s16, 4  ;;  %s1793_s29 = sshll.u32 (!%p217_p9), %s1856_s28, 4  ;;  %s2155_s17 = int_to_ptr.vmem [resolvable:$true] %s1565_s17  ;;  %s1794_s29 = int_to_ptr.vmem [resolvable:$false] %s1793_s29 }
  0x13   : > { %p1796_p0 = scmp.lt.s32.totalorder (!%p217_p9), %s2155_s17, %s1794_s29 }
  0x14   : > { %681 = vperm.xlu0 (!%p217_p9), %1783, %v671_v16   ;;  %691 = vperm.xlu1 (!%p217_p9), %1784, %v673_v17  }
  0x15   : > { %s2212_s9 = smov (!%p247_p10, %s1629_s9), 15 }
  0x16   : > { %s1630_s10 = sshll.u32 %s2212_s9, 3  ;;  %s1795_s9 = scalar_lea.vmem %s1794_s29, 1024 }
  0x17   : > { %s1946_s13 = scalar_lea.vmem %s2198_s0, %s1630_s10 }
  0x18   : > { %v254_v2 = vld [vmem:[%s1946_s13 + $0x8] sm:$0xff]  ;;  %v256_v3 = vld [vmem:[%s1946_s13 + $0x18] sm:$0xff]  ;;  %v253_v4 = vld [vmem:[%s1946_s13] sm:$0xff]  ;;  %1099 = vperm.xlu0 %1783, %v1096_v18  }
  0x19   : > { %278 = vmatprep.subr.mxu0 %v254_v2  ;;  %367 = vmatprep.subr.mxu1 %v256_v3  ;;  %v255_v5 = vld [vmem:[%s1946_s13 + $0x10] sm:$0xff]  ;;  %v258_v6 = vld [vmem:[%s1946_s13 + $0x28] sm:$0xff]  ;;  %v260_v7 = vld [vmem:[%s1946_s13 + $0x38] sm:$0xff] }
  0x1a   : > { %279 = vmatpush1.msra.mxu0 %v253_v4  ;;  %368 = vmatpush1.msra.mxu1 %v255_v5  ;;  %v257_v8 = vld [vmem:[%s1946_s13 + $0x20] sm:$0xff]  ;;  %v259_v9 = vld [vmem:[%s1946_s13 + $0x30] sm:$0xff] }
  0x1b   : > { %1631 = vmatmul.mubr.msk.f32.vlgmr.msra.gmra.mrb[0].mxu0 %vm265_vm0, %v261_v1  ;;  %1635 = vmatmul.mubr.msk.f32.vlgmr.msra.gmra.mrb[0].mxu1 %vm265_vm0, %v261_v1 }
  0x1c   : > { %348 = vmatprep.mubr.f32.mxu0 %v1853_v0  ;;  %437 = vmatprep.mubr.f32.mxu1 %v1853_v0 }
  0x1d   : > { %456 = vmatprep.subr.mxu0 %v258_v6  ;;  %545 = vmatprep.subr.mxu1 %v260_v7 }
  0x1e   : > { %457 = vmatpush1.msra.mxu0 %v257_v8  ;;  %546 = vmatpush1.msra.mxu1 %v259_v9 }
  0x1f   : > { %1632 = vmatmul.mubr.msk.f32.gmra.mrb[2].mxu0 %vm265_vm0, %v262_v10  ;;  %1636 = vmatmul.mubr.msk.f32.gmra.mrb[2].mxu1 %vm265_vm0, %v262_v10 }
  0x20   : > { %354 = vmatprep.mubr.f32.mxu0 %v1853_v0  ;;  %443 = vmatprep.mubr.f32.mxu1 %v1853_v0 }
  0x23   : > { %1633 = vmatmul.mubr.msk.f32.gmra.mrb[4].mxu0 %vm265_vm0, %v263_v11  ;;  %1637 = vmatmul.mubr.msk.f32.gmra.mrb[4].mxu1 %vm265_vm0, %v263_v11 }
  0x24   : > { %360 = vmatprep.mubr.f32.mxu0 %v1853_v0  ;;  %449 = vmatprep.mubr.f32.mxu1 %v1853_v0 }
  0x27   : > { %1634 = vmatmul.mubr.msk.f32.gmra.mrb[6].mxu0 %vm265_vm0, %v264_v12  ;;  %1638 = vmatmul.mubr.msk.f32.gmra.mrb[6].mxu1 %vm265_vm0, %v264_v12 }
  0x28   : > { %520 = vmatprep.mubr.f32.mxu0 %v1853_v0  ;;  %609 = vmatprep.mubr.f32.mxu1 %v1853_v0 }
  0x2b   : > { %1639 = vmatmul.mubr.msk.f32.vlgmr.msra.gmra.mrb[8].mxu0 %vm265_vm0, %v261_v1  ;;  %1643 = vmatmul.mubr.msk.f32.vlgmr.msra.gmra.mrb[8].mxu1 %vm265_vm0, %v261_v1 }
  0x2c   : > { %526 = vmatprep.mubr.f32.mxu0 %v1853_v0  ;;  %615 = vmatprep.mubr.f32.mxu1 %v1853_v0 }
  0x2f   : > { %1640 = vmatmul.mubr.msk.f32.gmra.mrb[10].mxu0 %vm265_vm0, %v262_v10  ;;  %1644 = vmatmul.mubr.msk.f32.gmra.mrb[10].mxu1 %vm265_vm0, %v262_v10 }
  0x30   : > { %532 = vmatprep.mubr.f32.mxu0 %v1853_v0  ;;  %621 = vmatprep.mubr.f32.mxu1 %v1853_v0 }
  0x33   : > { %1641 = vmatmul.mubr.msk.f32.gmra.mrb[12].mxu0 %vm265_vm0, %v263_v11  ;;  %1645 = vmatmul.mubr.msk.f32.gmra.mrb[12].mxu1 %vm265_vm0, %v263_v11 }
  0x34   : > { %538 = vmatprep.mubr.f32.mxu0 %v1853_v0  ;;  %627 = vmatprep.mubr.f32.mxu1 %v1853_v0 }
  0x37   : > { %1642 = vmatmul.mubr.msk.f32.gmra.mrb[14].mxu0 %vm265_vm0, %v264_v12  ;;  %1646 = vmatmul.mubr.msk.f32.gmra.mrb[14].mxu1 %vm265_vm0, %v264_v12 }
  0x38   : > { %771 = vmatprep.mubr.f32.mxu0 %v1853_v0  ;;  %860 = vmatprep.mubr.f32.mxu1 %v1853_v0 }
  0xee   : > { %v344_v19 = vpop.f32.mrb[0].mxu0  ;;  %v433_v20 = vpop.f32.mrb[0].mxu1 }
  0xef   : > { %v346_v21 = vpop.f32.mrb[1].mxu0  ;;  %v435_v22 = vpop.f32.mrb[1].mxu1  ;;  %v634_v25 = vmax.f32 %v344_v19, 0.0  ;;  %v636_v26 = vmax.f32 %v433_v20, 0.0 }
  0xf0   : > { %v635_v31 = vmax.f32 %v346_v21, 0.0  ;;  %v637_v32 = vmax.f32 %v435_v22, 0.0  ;;  %v668_v22 = vld [vmem:[%s2200_s2 + $0x10] sm:$0xff] }
  0xf2   : > { %v350_v23 = vpop.f32.mrb[2].mxu0  ;;  %v439_v24 = vpop.f32.mrb[2].mxu1 }
  0xf3   : > { %v642_v27 = vmax.f32 %v350_v23, 0.0  ;;  %v644_v28 = vmax.f32 %v439_v24, 0.0  ;;  %v352_v29 = vpop.f32.mrb[3].mxu0  ;;  %v441_v30 = vpop.f32.mrb[3].mxu1 }
  0xf4   : > { %v643_v33 = vmax.f32 %v352_v29, 0.0  ;;  %v645_v34 = vmax.f32 %v441_v30, 0.0 }
  0xf5   : > { %v1679_v35 = vpack.c.bf16 %v642_v27, %v634_v25  ;;  %v1687_v36 = vpack.c.bf16 %v644_v28, %v636_v26 }
  0xf6   : > { %v1677_v37 = vpack.c.bf16 %v643_v33, %v635_v31  ;;  %v1685_v38 = vpack.c.bf16 %v645_v34, %v637_v32  ;;  %v356_v39 = vpop.f32.mrb[4].mxu0  ;;  %v445_v40 = vpop.f32.mrb[4].mxu1 }
  0xf7   : > { %v358_v41 = vpop.f32.mrb[5].mxu0  ;;  %v447_v42 = vpop.f32.mrb[5].mxu1  ;;  %v650_v45 = vmax.f32 %v356_v39, 0.0  ;;  %v652_v46 = vmax.f32 %v445_v40, 0.0 }
  0xf8   : > { %1678 = vmatprep.subr.bf16.mxu0 %v1677_v37  ;;  %1686 = vmatprep.subr.bf16.mxu1 %v1685_v38  ;;  %v651_v51 = vmax.f32 %v358_v41, 0.0  ;;  %v653_v52 = vmax.f32 %v447_v42, 0.0  ;;  %v669_v37 = vld [vmem:[%s2200_s2 + $0x18] sm:$0xff]  ;;  %v2065_v40 = vpop.permute.xlu0 %676 }
  0xf9   : > { %1680 = vmatpush1.bf16.msra.mxu0 %v1679_v35  ;;  %1688 = vmatpush1.bf16.msra.mxu1 %v1687_v36 }
  0xfa   : > { %v362_v43 = vpop.f32.mrb[6].mxu0  ;;  %v451_v44 = vpop.f32.mrb[6].mxu1 }
  0xfb   : > { %v658_v47 = vmax.f32 %v362_v43, 0.0  ;;  %v660_v48 = vmax.f32 %v451_v44, 0.0  ;;  %v364_v49 = vpop.f32.mrb[7].mxu0  ;;  %v453_v50 = vpop.f32.mrb[7].mxu1 }
  0xfc   : > { %v659_v53 = vmax.f32 %v364_v49, 0.0  ;;  %v661_v54 = vmax.f32 %v453_v50, 0.0 }
  0xfd   : > { %v1683_v55 = vpack.c.bf16 %v658_v47, %v650_v45  ;;  %v1691_v56 = vpack.c.bf16 %v660_v48, %v652_v46  ;;  %v2067_v45 = vpop.permute.xlu0 %681  ;;  %v2071_v48 = vpop.permute.xlu1 %686 }
  0xfe   : > { %v1681_v57 = vpack.c.bf16 %v659_v53, %v651_v51  ;;  %v1689_v58 = vpack.c.bf16 %v661_v54, %v653_v52  ;;  %v522_v59 = vpop.f32.mrb[8].mxu0  ;;  %v611_v60 = vpop.f32.mrb[8].mxu1 }
  0xff   : > { %v524_v61 = vpop.f32.mrb[9].mxu0  ;;  %v613_v62 = vpop.f32.mrb[9].mxu1  ;;  %v638_v3 = vmax.f32 %v522_v59, 0.0  ;;  %v640_v4 = vmax.f32 %v611_v60, 0.0 }
 0x100   : > { %1682 = vmatprep.subr.bf16.mxu0 %v1681_v57  ;;  %1690 = vmatprep.subr.bf16.mxu1 %v1689_v58  ;;  %v639_v9 = vmax.f32 %v524_v61, 0.0  ;;  %v641_v10 = vmax.f32 %v613_v62, 0.0 }
 0x101   : > { %1684 = vmatpush1.bf16.msra.mxu0 %v1683_v55  ;;  %1692 = vmatpush1.bf16.msra.mxu1 %v1691_v56 }
 0x102   : > { %v528_v1 = vpop.f32.mrb[10].mxu0  ;;  %v617_v2 = vpop.f32.mrb[10].mxu1 }
 0x103   : > { %v646_v5 = vmax.f32 %v528_v1, 0.0  ;;  %v648_v6 = vmax.f32 %v617_v2, 0.0  ;;  %v530_v7 = vpop.f32.mrb[11].mxu0  ;;  %v619_v8 = vpop.f32.mrb[11].mxu1 }
 0x104   : > { %v647_v11 = vmax.f32 %v530_v7, 0.0  ;;  %v649_v12 = vmax.f32 %v619_v8, 0.0  ;;  %1647 = vmatmul.mubr.msk.f32.vlgmr.msra.gmra.mrb[16].mxu0 %vm694_vm1, %v2018_v63  ;;  %1651 = vmatmul.mubr.msk.f32.vlgmr.msra.gmra.mrb[16].mxu1 %vm694_vm1, %v2018_v63 }
 0x105   : > { %v1695_v13 = vpack.c.bf16 %v646_v5, %v638_v3  ;;  %v1703_v14 = vpack.c.bf16 %v648_v6, %v640_v4  ;;  %777 = vmatprep.mubr.f32.mxu0 %v1853_v0  ;;  %866 = vmatprep.mubr.f32.mxu1 %v1853_v0 }
 0x106   : > { %v1693_v16 = vpack.c.bf16 %v647_v11, %v639_v9  ;;  %v1701_v17 = vpack.c.bf16 %v649_v12, %v641_v10  ;;  %v534_v18 = vpop.f32.mrb[12].mxu0  ;;  %v623_v19 = vpop.f32.mrb[12].mxu1 }
 0x107   : > { %v536_v20 = vpop.f32.mrb[13].mxu0  ;;  %v625_v21 = vpop.f32.mrb[13].mxu1  ;;  %v654_v25 = vmax.f32 %v534_v18, 0.0  ;;  %v656_v26 = vmax.f32 %v623_v19, 0.0 }
 0x108   : > { %1648 = vmatmul.mubr.msk.f32.gmra.mrb[18].mxu0 %vm694_vm1, %v667_v15  ;;  %1652 = vmatmul.mubr.msk.f32.gmra.mrb[18].mxu1 %vm694_vm1, %v667_v15  ;;  %v655_v31 = vmax.f32 %v536_v20, 0.0  ;;  %v657_v32 = vmax.f32 %v625_v21, 0.0  ;;  %v2079_v12 = vpop.permute.xlu1 %691 }
 0x109   : > { %1694 = vmatprep.subr.bf16.mxu0 %v1693_v16  ;;  %1702 = vmatprep.subr.bf16.mxu1 %v1701_v17 }
 0x10a   : > { %1696 = vmatpush1.bf16.msra.mxu0 %v1695_v13  ;;  %1704 = vmatpush1.bf16.msra.mxu1 %v1703_v14  ;;  %v540_v23 = vpop.f32.mrb[14].mxu0  ;;  %v629_v24 = vpop.f32.mrb[14].mxu1 }
 0x10b   : > { %v662_v27 = vmax.f32 %v540_v23, 0.0  ;;  %v664_v28 = vmax.f32 %v629_v24, 0.0  ;;  %v542_v29 = vpop.f32.mrb[15].mxu0  ;;  %v631_v30 = vpop.f32.mrb[15].mxu1  ;;  %783 = vmatprep.mubr.f32.mxu0 %v1853_v0  ;;  %872 = vmatprep.mubr.f32.mxu1 %v1853_v0 }
 0x10c   : > { %v663_v33 = vmax.f32 %v542_v29, 0.0  ;;  %v665_v34 = vmax.f32 %v631_v30, 0.0  ;;  %1649 = vmatmul.mubr.msk.f32.gmra.mrb[20].mxu0 %vm694_vm1, %v668_v22  ;;  %1653 = vmatmul.mubr.msk.f32.gmra.mrb[20].mxu1 %vm694_vm1, %v668_v22 }
 0x10d   : > { %v1699_v35 = vpack.c.bf16 %v662_v27, %v654_v25  ;;  %v1707_v36 = vpack.c.bf16 %v664_v28, %v656_v26  ;;  %789 = vmatprep.mubr.f32.mxu0 %v1853_v0  ;;  %878 = vmatprep.mubr.f32.mxu1 %v1853_v0 }
 0x10e   : > { %v1697_v38 = vpack.c.bf16 %v663_v33, %v655_v31  ;;  %v1705_v39 = vpack.c.bf16 %v665_v34, %v657_v32 }
 0x110   : > { %1650 = vmatmul.mubr.msk.f32.gmra.mrb[22].mxu0 %vm694_vm1, %v669_v37  ;;  %1654 = vmatmul.mubr.msk.f32.gmra.mrb[22].mxu1 %vm694_vm1, %v669_v37 }
 0x111   : > { %1698 = vmatprep.subr.bf16.mxu0 %v1697_v38  ;;  %1706 = vmatprep.subr.bf16.mxu1 %v1705_v39 }
 0x112   : > { %1700 = vmatpush1.bf16.msra.mxu0 %v1699_v35  ;;  %1708 = vmatpush1.bf16.msra.mxu1 %v1707_v36 }
 0x113   : > { %949 = vmatprep.mubr.f32.mxu0 %v1853_v0  ;;  %1038 = vmatprep.mubr.f32.mxu1 %v1853_v0 }
 0x115   : > { %1655 = vmatmul.mubr.msk.f32.vlgmr.msra.gmra.mrb[24].mxu0 %vm694_vm1, %v2018_v63  ;;  %1659 = vmatmul.mubr.msk.f32.vlgmr.msra.gmra.mrb[24].mxu1 %vm694_vm1, %v2018_v63 }
 0x116   : > { %955 = vmatprep.mubr.f32.mxu0 %v1853_v0  ;;  %1044 = vmatprep.mubr.f32.mxu1 %v1853_v0 }
 0x119   : > { %1656 = vmatmul.mubr.msk.f32.gmra.mrb[26].mxu0 %vm694_vm1, %v667_v15  ;;  %1660 = vmatmul.mubr.msk.f32.gmra.mrb[26].mxu1 %vm694_vm1, %v667_v15 }
 0x11a   : > { %961 = vmatprep.mubr.f32.mxu0 %v1853_v0  ;;  %1050 = vmatprep.mubr.f32.mxu1 %v1853_v0 }
 0x11d   : > { %1657 = vmatmul.mubr.msk.f32.gmra.mrb[28].mxu0 %vm694_vm1, %v668_v22  ;;  %1661 = vmatmul.mubr.msk.f32.gmra.mrb[28].mxu1 %vm694_vm1, %v668_v22 }
 0x11e   : > { %967 = vmatprep.mubr.f32.mxu0 %v1853_v0  ;;  %1056 = vmatprep.mubr.f32.mxu1 %v1853_v0 }
 0x121   : > { %1658 = vmatmul.mubr.msk.f32.gmra.mrb[30].mxu0 %vm694_vm1, %v669_v37  ;;  %1662 = vmatmul.mubr.msk.f32.gmra.mrb[30].mxu1 %vm694_vm1, %v669_v37 }
 0x122   : > { %1169 = vmatprep.mubr.f32.mxu0 %v1853_v0  ;;  %1240 = vmatprep.mubr.f32.mxu1 %v1853_v0 }
 0x1d7   : > { %v773_v41 = vpop.f32.mrb[16].mxu0  ;;  %v862_v42 = vpop.f32.mrb[16].mxu1 }
 0x1d8   : > { %v775_v43 = vpop.f32.mrb[17].mxu0  ;;  %v864_v44 = vpop.f32.mrb[17].mxu1  ;;  %v774_v46 = vadd.f32 %v773_v41, %v2065_v40  ;;  %v863_v47 = vadd.f32 %v862_v42, %v2065_v40 }
 0x1d9   : > { %v776_v49 = vadd.f32 %v775_v43, %v2065_v40  ;;  %v865_v50 = vadd.f32 %v864_v44, %v2065_v40 }
 0x1da   : > { %v1063_v59 = vmax.f32 %v774_v46, 0.0  ;;  %v1065_v60 = vmax.f32 %v863_v47, 0.0 }
 0x1db   : > { %v779_v51 = vpop.f32.mrb[18].mxu0  ;;  %v868_v52 = vpop.f32.mrb[18].mxu1  ;;  %v1064_v63 = vmax.f32 %v776_v49, 0.0  ;;  %v1066_v1 = vmax.f32 %v865_v50, 0.0  ;;  %v1095_v50 = vld [vmem:[%s2202_s4] sm:$0x7] }
 0x1dc   : > { %v781_v53 = vpop.f32.mrb[19].mxu0  ;;  %v870_v54 = vpop.f32.mrb[19].mxu1  ;;  %v780_v55 = vadd.f32 %v779_v51, %v2067_v45  ;;  %v869_v56 = vadd.f32 %v868_v52, %v2067_v45 }
 0x1dd   : > { %v782_v57 = vadd.f32 %v781_v53, %v2067_v45  ;;  %v871_v58 = vadd.f32 %v870_v54, %v2067_v45 }
 0x1de   : > { %v1071_v61 = vmax.f32 %v780_v55, 0.0  ;;  %v1073_v62 = vmax.f32 %v869_v56, 0.0 }
 0x1df   : > { %v1072_v2 = vmax.f32 %v782_v57, 0.0  ;;  %v1074_v3 = vmax.f32 %v871_v58, 0.0  ;;  %v785_v4 = vpop.f32.mrb[20].mxu0  ;;  %v874_v5 = vpop.f32.mrb[20].mxu1 }
 0x1e0   : > { %v787_v6 = vpop.f32.mrb[21].mxu0  ;;  %v876_v7 = vpop.f32.mrb[21].mxu1  ;;  %v1711_v8 = vpack.c.bf16 %v1071_v61, %v1063_v59  ;;  %v1719_v9 = vpack.c.bf16 %v1073_v62, %v1065_v60  ;;  %v786_v13 = vadd.f32 %v785_v4, %v2071_v48  ;;  %v875_v14 = vadd.f32 %v874_v5, %v2071_v48 }
 0x1e1   : > { %v1709_v10 = vpack.c.bf16 %v1072_v2, %v1064_v63  ;;  %v1717_v11 = vpack.c.bf16 %v1074_v3, %v1066_v1  ;;  %v788_v15 = vadd.f32 %v787_v6, %v2071_v48  ;;  %v877_v16 = vadd.f32 %v876_v7, %v2071_v48 }
 0x1e2   : > { %v1079_v25 = vmax.f32 %v786_v13, 0.0  ;;  %v1081_v26 = vmax.f32 %v875_v14, 0.0 }
 0x1e3   : > { %v791_v17 = vpop.f32.mrb[22].mxu0  ;;  %v880_v18 = vpop.f32.mrb[22].mxu1  ;;  %1710 = vmatprep.subr.bf16.mxu0 %v1709_v10  ;;  %1718 = vmatprep.subr.bf16.mxu1 %v1717_v11  ;;  %v1080_v29 = vmax.f32 %v788_v15, 0.0  ;;  %v1082_v30 = vmax.f32 %v877_v16, 0.0 }
 0x1e4   : > { %v793_v19 = vpop.f32.mrb[23].mxu0  ;;  %v882_v20 = vpop.f32.mrb[23].mxu1  ;;  %1712 = vmatpush1.bf16.msra.mxu0 %v1711_v8  ;;  %1720 = vmatpush1.bf16.msra.mxu1 %v1719_v9  ;;  %v792_v21 = vadd.f32 %v791_v17, %v2079_v12  ;;  %v881_v22 = vadd.f32 %v880_v18, %v2079_v12 }
 0x1e5   : > { %v794_v23 = vadd.f32 %v793_v19, %v2079_v12  ;;  %v883_v24 = vadd.f32 %v882_v20, %v2079_v12 }
 0x1e6   : > { %v1087_v27 = vmax.f32 %v792_v21, 0.0  ;;  %v1089_v28 = vmax.f32 %v881_v22, 0.0 }
 0x1e7   : > { %v1088_v31 = vmax.f32 %v794_v23, 0.0  ;;  %v1090_v32 = vmax.f32 %v883_v24, 0.0 }
 0x1e8   : > { %v951_v33 = vpop.f32.mrb[24].mxu0  ;;  %v1040_v34 = vpop.f32.mrb[24].mxu1  ;;  %v1715_v35 = vpack.c.bf16 %v1087_v27, %v1079_v25  ;;  %v1723_v36 = vpack.c.bf16 %v1089_v28, %v1081_v26 }
 0x1e9   : > { %v1713_v37 = vpack.c.bf16 %v1088_v31, %v1080_v29  ;;  %v1721_v38 = vpack.c.bf16 %v1090_v32, %v1082_v30  ;;  %v953_v39 = vpop.f32.mrb[25].mxu0  ;;  %v1042_v41 = vpop.f32.mrb[25].mxu1  ;;  %v952_v42 = vadd.f32 %v951_v33, %v2065_v40  ;;  %v1041_v43 = vadd.f32 %v1040_v34, %v2065_v40  ;;  %v1389_v33 = vld [vmem:[%s1946_s13] sm:$0x3] }
 0x1ea   : > { %v954_v44 = vadd.f32 %v953_v39, %v2065_v40  ;;  %v1043_v46 = vadd.f32 %v1042_v41, %v2065_v40  ;;  %v1444_v32 = vlaneseq }
 0x1eb   : > { %1714 = vmatprep.subr.bf16.mxu0 %v1713_v37  ;;  %1722 = vmatprep.subr.bf16.mxu1 %v1721_v38  ;;  %v1067_v57 = vmax.f32 %v952_v42, 0.0  ;;  %v1069_v40 = vmax.f32 %v1041_v43, 0.0  ;;  %v1390_v37 = vld [vmem:[%s1946_s13 + $0x8] sm:$0x3]  ;;  %v1392_v38 = vld [vmem:[%s1946_s13 + $0x18] sm:$0x3] }
 0x1ec   : > { %v957_v47 = vpop.f32.mrb[26].mxu0  ;;  %v1046_v49 = vpop.f32.mrb[26].mxu1  ;;  %1716 = vmatpush1.bf16.msra.mxu0 %v1715_v35  ;;  %1724 = vmatpush1.bf16.msra.mxu1 %v1723_v36  ;;  %v1068_v60 = vmax.f32 %v954_v44, 0.0  ;;  %v1070_v61 = vmax.f32 %v1043_v46, 0.0  ;;  %v1445_v35 = vshrl.u32 %v1444_v32, 7  ;;  %v1437_v39 = vcombine.low %v1389_v33, %v1390_v37 }
 0x1ed   : > { %v958_v51 = vadd.f32 %v957_v47, %v2067_v45  ;;  %v1047_v52 = vadd.f32 %v1046_v49, %v2067_v45  ;;  %v959_v53 = vpop.f32.mrb[27].mxu0  ;;  %v1048_v54 = vpop.f32.mrb[27].mxu1  ;;  %v1391_v36 = vld [vmem:[%s1946_s13 + $0x10] sm:$0x3]  ;;  %v1393_v46 = vld [vmem:[%s1946_s13 + $0x20] sm:$0x3] }
 0x1ee   : > { %v960_v55 = vadd.f32 %v959_v53, %v2067_v45  ;;  %v1049_v56 = vadd.f32 %v1048_v54, %v2067_v45  ;;  %v1438_v41 = vcombine.low %v1391_v36, %v1392_v38  ;;  %v1395_v47 = vld [vmem:[%s1946_s13 + $0x30] sm:$0x3]  ;;  %v1394_v49 = vld [vmem:[%s1946_s13 + $0x28] sm:$0x3] }
 0x1ef   : > { %v1075_v58 = vmax.f32 %v958_v51, 0.0  ;;  %v1077_v59 = vmax.f32 %v1047_v52, 0.0  ;;  %1663 = vmatmul.mubr.msk.f32.vlgmr.msra.gmra.mrb[32].mxu0 %vm694_vm1, %v1095_v50  ;;  %1664 = vmatmul.mubr.msk.f32.vlgmr.msra.gmra.mrb[32].mxu1 %vm694_vm1, %v1095_v50  ;;  %v1396_v51 = vld [vmem:[%s1946_s13 + $0x38] sm:$0x3] }
 0x1f0   : > { %v1076_v62 = vmax.f32 %v960_v55, 0.0  ;;  %v1078_v63 = vmax.f32 %v1049_v56, 0.0  ;;  %v963_v1 = vpop.f32.mrb[28].mxu0  ;;  %v1052_v2 = vpop.f32.mrb[28].mxu1  ;;  %1311 = vmatprep.mubr.f32.mxu0 %v1853_v0  ;;  %1382 = vmatprep.mubr.f32.mxu1 %v1853_v0  ;;  %v1440_v53 = vcombine.low %v1395_v47, %v1396_v51 }
 0x1f1   : > { %v1727_v3 = vpack.c.bf16 %v1075_v58, %v1067_v57  ;;  %v1735_v45 = vpack.c.bf16 %v1077_v59, %v1069_v40  ;;  %v965_v4 = vpop.f32.mrb[29].mxu0  ;;  %v1054_v5 = vpop.f32.mrb[29].mxu1  ;;  %v964_v8 = vadd.f32 %v963_v1, %v2071_v48  ;;  %v1053_v9 = vadd.f32 %v1052_v2, %v2071_v48  ;;  %v1667_v40 = vld [vmem:[%s1946_s13 + $0x4] ss:$8 sm:$0xf] }
 0x1f2   : > { %v1725_v6 = vpack.c.bf16 %v1076_v62, %v1068_v60  ;;  %v1733_v7 = vpack.c.bf16 %v1078_v63, %v1070_v61  ;;  %v966_v10 = vadd.f32 %v965_v4, %v2071_v48  ;;  %v1055_v11 = vadd.f32 %v1054_v5, %v2071_v48  ;;  %v1668_v58 = vld [vmem:[%s1946_s13 + $0x4] ss:$8 sm:$0xf0]  ;;  %v1100_v63 = vpop.permute.xlu0 %1099  ;;  %s1676_s13 = sshll.u32 %s1913_s25, 9  ;;  %s1789_s25 = scalar_lea.vmem %s2155_s17, 512 }
 0x1f3   : > { %v1083_v20 = vmax.f32 %v964_v8, 0.0  ;;  %v1085_v21 = vmax.f32 %v1053_v9, 0.0  ;;  %v1400_v59 = vor.u32 %v1668_v58, %v1667_v40  ;;  %s2153_s20 = scalar_lea.hbm %s2204_s6, %s1676_s13  ;;  %p1790_p11 = scmp.ne.s32.totalorder %s2155_s17, %s1789_s25 }
 0x1f4   : > { %v969_v13 = vpop.f32.mrb[30].mxu0  ;;  %v1058_v14 = vpop.f32.mrb[30].mxu1  ;;  %1726 = vmatprep.subr.bf16.mxu0 %v1725_v6  ;;  %1734 = vmatprep.subr.bf16.mxu1 %v1733_v7  ;;  %v1084_v23 = vmax.f32 %v966_v10, 0.0  ;;  %v1086_v24 = vmax.f32 %v1055_v11, 0.0  ;;  %p1797_p1 = scmp.lt.s32.totalorder %s1795_s9, %s1789_s25 }
 0x1f5   : > { %v970_v0 = vadd.f32 %v969_v13, %v2079_v12  ;;  %v1059_v15 = vadd.f32 %v1058_v14, %v2079_v12  ;;  %v971_v16 = vpop.f32.mrb[31].mxu0  ;;  %v1060_v17 = vpop.f32.mrb[31].mxu1  ;;  %1728 = vmatpush1.bf16.msra.mxu0 %v1727_v3  ;;  %1736 = vmatpush1.bf16.msra.mxu1 %v1735_v45  ;;  %p1791_p12 = pnand %p1790_p11, %p1930_p5 }
 0x1f6   : > { %v972_v18 = vadd.f32 %v971_v16, %v2079_v12  ;;  %v1061_v19 = vadd.f32 %v1060_v17, %v2079_v12  ;;  %v1855_v12 = vmov 1966171168   ;;  %p1798_p2 = por %p1797_p1, %p1796_p0 }
 0x1f7   : > { %v1091_v22 = vmax.f32 %v970_v0, 0.0  ;;  %v1093_v48 = vmax.f32 %v1059_v15, 0.0  ;;  %v1442_v31 = vunpack.c.l.s4 %v1855_v12  ;;  %p1792_p13 = pneg %p1791_p12 }
 0x1f8   : > { %v1092_v25 = vmax.f32 %v972_v18, 0.0  ;;  %v1094_v26 = vmax.f32 %v1061_v19, 0.0 }
 0x1f9   : > { %v1731_v27 = vpack.c.bf16 %v1091_v22, %v1083_v20  ;;  %v1739_v28 = vpack.c.bf16 %v1093_v48, %v1085_v21  ;;  %v1443_v34 = vunpack.c.0.s8 %v1442_v31  ;;  %p1799_p3 = pnand %p1798_p2, %p1792_p13 }
 0x1fa   : > { %v1729_v29 = vpack.c.bf16 %v1092_v25, %v1084_v23  ;;  %v1737_v30 = vpack.c.bf16 %v1094_v26, %v1086_v24 }
 0x1fb   : > { %v2118_v42 = vsub.s32 %v1443_v34, %v1445_v35 }
 0x1fc   : > { %1730 = vmatprep.subr.bf16.mxu0 %v1729_v29  ;;  %1738 = vmatprep.subr.bf16.mxu1 %v1737_v30 }
 0x1fd   : > { %1732 = vmatpush1.bf16.msra.mxu0 %v1731_v27  ;;  %1740 = vmatpush1.bf16.msra.mxu1 %v1739_v28  ;;  %v1447_v43 = vrot.slane %v1437_v39, %v2118_v42  ;;  %v1454_v44 = vrot.slane %v1438_v41, %v2118_v42  ;;  %v1468_v55 = vrot.slane %v1440_v53, %v2118_v42 }
 0x1ff   : > { %v1469_v52 = vcombine.low %v1447_v43, %v1454_v44 }
 0x200   : > { %1665 = vmatmul.mubr.msk.f32.vlgmr.msra.gmra.mrb[34].mxu0 %vm694_vm1, %v1095_v50  ;;  %1666 = vmatmul.mubr.msk.f32.vlgmr.msra.gmra.mrb[34].mxu1 %vm694_vm1, %v1095_v50  ;;  %v1439_v50 = vcombine.low %v1393_v46, %v1394_v49 }
 0x201   : > { %v1477_v56 = vrot.slane %v1469_v52, %v2118_v42 }
 0x202   : > { %v1461_v54 = vrot.slane %v1439_v50, %v2118_v42 }
 0x204   : > { %v1470_v57 = vcombine.low %v1461_v54, %v1468_v55 }
 0x206   : > { %v1484_v60 = vrot.slane %v1470_v57, %v2118_v42 }
 0x208   : > { %v1485_v61 = vcombine.low %v1477_v56, %v1484_v60 }
 0x20a   : > { %v1487_v62 = vmul.f32 %v1485_v61, %v1400_v59 }
 0x20c   : > { %1669 = vst [vmem:[%s2135_s16 + $0x2] ss:$4 sm:$0xff] %v1487_v62 }
 0x2c2   : > { %v1171_v1 = vpop.f32.mrb[32].mxu0  ;;  %v1242_v2 = vpop.f32.mrb[32].mxu1 }
 0x2c3   : > { %v1172_v3 = vadd.f32 %v1171_v1, %v1100_v63  ;;  %v1243_v45 = vadd.f32 %v1242_v2, %v1100_v63  ;;  %v1173_v4 = vpop.f32.mrb[33].mxu0  ;;  %v1244_v5 = vpop.f32.mrb[33].mxu1 }
 0x2c4   : > { %v1174_v6 = vadd.f32 %v1173_v4, %v1100_v63  ;;  %v1245_v7 = vadd.f32 %v1244_v5, %v1100_v63 }
 0x2c5   : > { %v1401_v8 = vsub.f32 %v1389_v33, %v1172_v3  ;;  %v1403_v9 = vsub.f32 %v1391_v36, %v1243_v45 }
 0x2c6   : > { %v1402_v10 = vsub.f32 %v1390_v37, %v1174_v6  ;;  %v1498_v11 = vcombine.low %v1172_v3, %v1174_v6  ;;  %v1404_v13 = vsub.f32 %v1392_v38, %v1245_v7  ;;  %v1499_v14 = vcombine.low %v1243_v45, %v1245_v7 }
 0x2c8   : > { %v1417_v0 = vcombine.low %v1401_v8, %v1402_v10  ;;  %v1508_v15 = vrot.slane %v1498_v11, %v2118_v42  ;;  %v1418_v16 = vcombine.low %v1403_v9, %v1404_v13  ;;  %v1515_v17 = vrot.slane %v1499_v14, %v2118_v42 }
 0x2ca   : > { %1425 = vst [vmem:[%s2135_s16] sm:$0x33] %v1417_v0  ;;  %1426 = vst [vmem:[%s2135_s16 + $0x8] sm:$0x33] %v1418_v16  ;;  %v1530_v18 = vcombine.low %v1508_v15, %v1515_v17 }
 0x2cc   : > { %v1538_v36 = vrot.slane %v1530_v18, %v2118_v42 }
 0x2d3   : > { %v1313_v19 = vpop.f32.mrb[34].mxu0  ;;  %v1384_v20 = vpop.f32.mrb[34].mxu1 }
 0x2d4   : > { %v1314_v21 = vadd.f32 %v1313_v19, %v1100_v63  ;;  %v1385_v22 = vadd.f32 %v1384_v20, %v1100_v63  ;;  %v1315_v48 = vpop.f32.mrb[35].mxu0  ;;  %v1386_v23 = vpop.f32.mrb[35].mxu1 }
 0x2d5   : > { %v1316_v24 = vadd.f32 %v1315_v48, %v1100_v63  ;;  %v1387_v25 = vadd.f32 %v1386_v23, %v1100_v63 }
 0x2d6   : > { %v1405_v26 = vsub.f32 %v1393_v46, %v1314_v21  ;;  %v1407_v27 = vsub.f32 %v1395_v47, %v1385_v22 }
 0x2d7   : > { %v1406_v28 = vsub.f32 %v1394_v49, %v1316_v24  ;;  %v1500_v29 = vcombine.low %v1314_v21, %v1316_v24  ;;  %v1408_v30 = vsub.f32 %v1396_v51, %v1387_v25  ;;  %v1501_v12 = vcombine.low %v1385_v22, %v1387_v25 }
 0x2d9   : > { %v1419_v31 = vcombine.low %v1405_v26, %v1406_v28  ;;  %v1522_v32 = vrot.slane %v1500_v29, %v2118_v42  ;;  %v1420_v33 = vcombine.low %v1407_v27, %v1408_v30  ;;  %v1529_v34 = vrot.slane %v1501_v12, %v2118_v42 }
 0x2db   : > { %1427 = vst [vmem:[%s2135_s16 + $0x10] sm:$0x33] %v1419_v31  ;;  %1428 = vst [vmem:[%s2135_s16 + $0x18] sm:$0x33] %v1420_v33  ;;  %v1531_v35 = vcombine.low %v1522_v32, %v1529_v34 }
 0x2dd   : > { %v1545_v37 = vrot.slane %v1531_v35, %v2118_v42 }
 0x2df   : > { %v1546_v38 = vcombine.high %v1538_v36, %v1545_v37 }
 0x2e1   : > { %1670 = vst [vmem:[%s2135_s16 + $0x3] ss:$4 sm:$0xff] %v1546_v38 }
 0x2e2   : > { %1802 = shalt.err (!%p1799_p3)
}
 0x2e3   : > { %s1803_s10 = scalar_lea.hbm %s2153_s20, 512  ;;  %s1807_s14 = scalar_lea.hbm %s2204_s6, 1024 }
 0x2e4   : > { %p1804_p4 = scmp.ne.s32.totalorder %s2153_s20, %s1803_s10  ;;  %p1808_p9 = scmp.lt.u32.totalorder %s2153_s20, %s2204_s6 }
 0x2e5   : > { %p1809_p10 = scmp.lt.u32.totalorder %s1807_s14, %s1803_s10  ;;  %p1811_p12 = scmp.lt.u32.totalorder %s1803_s10, %s2153_s20 }
 0x2e6   : > { %p1805_p7 = pnand %p1804_p4, %p1930_p5 }
 0x2e7   : > { %p1810_p11 = por %p1809_p10, %p1808_p9 }
 0x2e8   : > { %p1806_p8 = pneg %p1805_p7 }
 0x2e9   : > { %p1812_p13 = por %p1811_p12, %p1810_p11 }
 0x2eb   : > { %p1813_p0 = pnand %p1812_p13, %p1806_p8 }
 0x2ed   : > { %1816 = shalt.err (!%p1813_p0)
}
 0x2ee   : > { %1741 = dma.vmem_to_hbm [thread:$0]  (%p1930_p5), %s2155_s17, 512, %s2153_s20, %s1551_s26  }
 0x2ef PF: > { %p1747_p1 = scmp.ge.s32.totalorder %s1851_s24, 2  ;;  %s1577_s13 = sand.u32 1, %s1839_s21  }
 0x2f0   : > { %s1578_s18 = scalar_lea.sflag [#allocation3], %s1577_s13 }
 0x2f1   : > { %p1744_p2 = pnand %p1747_p1, %p1934_p6 }
 0x2f3   : > { %1834 = dma.done.wait (!%p1744_p2), %s1578_s18, 512  }
 0x2f4   : > { %1836 = vsyncadd (!%p1744_p2), %s1578_s18, 4294966784  ;;  %p16_p3 = scmp.ge.s32.totalorder %s1917_s27, 4   ;;  %s2207_s21 = smov %s1843_s22 }
 0x2f5   : > { %s2208_s22 = smov %s1847_s23  ;;  %s2209_s23 = smov %s1928_s30 }
 0x2f6   : > { %s2210_s24 = smov %s1917_s27  ;;  %18 = sbr.rel (!%p16_p3) target bundleno = 3 (0x3), region = 82 }
 0x2fd   :  { %1583 = vsyncpa [#allocation3], 1 }
 0x2fe   :  { %1585 = vsyncpa [#allocation3 + $0x1], 1 }

</bundles_post_ra>
